<compile_context>
chip_gen: v7x
topology: tpu7x:2x2x1
jax: 0.10.0
libtpu: 0.0.40
codegen_flags: <defaults>
</compile_context>

<pallas_src>
import functools

import jax
import jax.numpy as jnp
from jax import lax
from jax.experimental import pallas as pl
from jax.experimental.pallas import tpu as pltpu


def _round_up(v, m):
    return (v + m - 1) // m * m


def _dilated_residual_kernel(x_prev_ref, x_cur_ref, x_next_ref,
                             wl_ref, wm_ref, wr_ref, bd_ref, w1_ref, b1_ref,
                             o_ref, *, t_tile, halo, seq_len, dilation,
                             compute_dtype):
    """One (batch, time-tile) grid step.

    x_prev_ref / x_next_ref: (halo, C) rows immediately before / after the
                             current tile (block index clamped at the edges).
    x_cur_ref:               (t_tile, C) current time tile.
    wl/wm/wr_ref:            (C, C) dilated-conv taps for x[t-d] / x[t] / x[t+d].
    bd_ref, b1_ref:          (1, C) biases (f32).
    w1_ref:                  (C, C) 1x1-conv weight.
    o_ref:                   (t_tile, C).
    """
    d = dilation
    j = pl.program_id(1)

    x_cur = x_cur_ref[...]                                   # (tT, C)
    prev = x_prev_ref[...]                                   # (H, C)
    nxt = x_next_ref[...]                                    # (H, C)

    # x[t - d] and x[t + d] for every row t of the current tile.
    left = jnp.concatenate([prev[halo - d:, :], x_cur[:t_tile - d, :]], axis=0)
    right = jnp.concatenate([x_cur[d:, :], nxt[:d, :]], axis=0)

    # Zero taps falling outside [0, seq_len)  (== Conv1d zero padding).  This
    # also keeps garbage from clamped edge halo blocks / partial tiles out of
    # every valid output row.
    t = lax.broadcasted_iota(jnp.int32, (t_tile, 1), 0) + j * t_tile
    left = jnp.where(t >= d, left, 0.0)
    right = jnp.where(t + d < seq_len, right, 0.0)

    cd = compute_dtype
    acc = jnp.dot(x_cur.astype(cd), wm_ref[...], preferred_element_type=jnp.float32)
    acc = acc + jnp.dot(left.astype(cd), wl_ref[...], preferred_element_type=jnp.float32)
    acc = acc + jnp.dot(right.astype(cd), wr_ref[...], preferred_element_type=jnp.float32)
    h = jnp.maximum(acc + bd_ref[...], 0.0)                  # bias + ReLU in f32

    out = jnp.dot(h.astype(cd), w1_ref[...],
                  preferred_element_type=jnp.float32) + b1_ref[...]

    # TODO(synk): dropout implemented as identity (eval-mode semantics);
    # training-mode parity would need an in-kernel PRNG mask.
    o_ref[...] = (x_cur.astype(jnp.float32) + out).astype(o_ref.dtype)


def dilated_residual_layer_ntc(x_ntc, w_dil, b_dil, w_1x1, b_1x1, dilation, *,
                               time_tile=2048, compute_dtype=jnp.bfloat16):
    """Channels-last entry point.  x_ntc: (N, T, C) -> (N, T, C)."""
    N, T, C = x_ntc.shape
    C_out = w_dil.shape[0]
    assert C == C_out, "residual add requires in_channels == out_channels"
    d = int(dilation)

    itemsize = jnp.dtype(x_ntc.dtype).itemsize

    # Halo rows: multiple of 8, >= dilation, so a single neighbouring block on
    # each side covers x[t +/- d] for every row of the tile.
    H = _round_up(max(d, 1), 8)

    # Time tile: multiple of H (so halo block indices are exact), bounded by a
    # conservative double-buffered VMEM budget and by the sequence length.
    tile_budget_bytes = 24 * 2**20
    rows_cap = max(H, tile_budget_bytes // (4 * C * itemsize))
    tT = min(int(time_tile), rows_cap, _round_up(T, 8))
    tT = _round_up(max(tT, H), H)
    n_t = pl.cdiv(T, tT)
    r = tT // H                      # halo blocks per time tile
    n_halo = pl.cdiv(T, H)           # halo blocks along the full sequence

    # Conv1d weight (C_out, C_in, 3): tap 0 -> x[t-d], 1 -> x[t], 2 -> x[t+d].
    wl = jnp.transpose(w_dil[:, :, 0]).astype(compute_dtype)   # (C_in, C_out)
    wm = jnp.transpose(w_dil[:, :, 1]).astype(compute_dtype)
    wr = jnp.transpose(w_dil[:, :, 2]).astype(compute_dtype)
    w1 = jnp.transpose(w_1x1[:, :, 0]).astype(compute_dtype)
    bd = b_dil.reshape(1, C).astype(jnp.float32)
    b1 = b_1x1.reshape(1, C).astype(jnp.float32)

    kernel = functools.partial(_dilated_residual_kernel, t_tile=tT, halo=H,
                               seq_len=T, dilation=d, compute_dtype=compute_dtype)

    # VMEM: double-buffered {current tile, output tile, 2 halos, weights}.
    # Clamp to ~48 MiB so the same derivation is safe on v7x (64 MiB/TC).
    per_step = (2 * tT * C * itemsize + 2 * H * C * itemsize
                + 4 * C * C * jnp.dtype(compute_dtype).itemsize + 2 * C * 4)
    vmem_limit = int(min(48 * 2**20, max(16 * 2**20, 3 * per_step)))

    tile_spec = pl.BlockSpec((None, tT, C), lambda n, j: (n, j, 0))
    prev_spec = pl.BlockSpec((None, H, C),
                             lambda n, j: (n, jnp.maximum(j * r - 1, 0), 0))
    next_spec = pl.BlockSpec((None, H, C),
                             lambda n, j: (n, jnp.minimum((j + 1) * r, n_halo - 1), 0))
    w_spec = lambda shape: pl.BlockSpec(shape, lambda n, j: (0, 0))

    y = pl.pallas_call(
        kernel,
        out_shape=jax.ShapeDtypeStruct((N, T, C), x_ntc.dtype),
        grid_spec=pltpu.PrefetchScalarGridSpec(
            num_scalar_prefetch=0,
            grid=(N, n_t),
            in_specs=[
                prev_spec,            # halo rows just before the tile
                tile_spec,            # current tile (also the residual)
                next_spec,            # halo rows just after the tile
                w_spec((C, C)),       # wl
                w_spec((C, C)),       # wm
                w_spec((C, C)),       # wr
                w_spec((1, C)),       # bd
                w_spec((C, C)),       # w1
                w_spec((1, C)),       # b1
            ],
            out_specs=pl.BlockSpec((None, tT, C), lambda n, j: (n, j, 0)),
        ),
        compiler_params=pltpu.CompilerParams(
            dimension_semantics=("parallel", "parallel"),
            vmem_limit_bytes=vmem_limit),
    )(x_ntc, x_ntc, x_ntc, wl, wm, wr, bd, w1, b1)
    return y


def dilated_residual_layer(x_nct, w_dil, b_dil, w_1x1, b_1x1, dilation, **kwargs):
    """PyTorch-layout wrapper: x_nct (N, C, T) -> (N, C, T).

    The transposes exist only for parity with the PyTorch module; a real
    multi-layer model should keep activations in (N, T, C) and call
    dilated_residual_layer_ntc directly so no per-layer transpose passes hit HBM.
    """
    x_ntc = jnp.transpose(x_nct, (0, 2, 1))
    y_ntc = dilated_residual_layer_ntc(x_ntc, w_dil, b_dil, w_1x1, b_1x1,
                                       dilation, **kwargs)
    return jnp.transpose(y_ntc, (0, 2, 1))


def _reference(x_nct, w_dil, b_dil, w_1x1, b_1x1, dilation):
    """Pure-JAX reference (matches PyTorch eval-mode forward)."""
    dn = ("NCH", "OIH", "NCH")
    h = lax.conv_general_dilated(
        x_nct, w_dil, window_strides=(1,), padding=[(dilation, dilation)],
        rhs_dilation=(dilation,), dimension_numbers=dn)
    h = jnp.maximum(h + b_dil[None, :, None], 0.0)
    o = lax.conv_general_dilated(
        h, w_1x1, window_strides=(1,), padding=[(0, 0)], dimension_numbers=dn)
    return x_nct + o + b_1x1[None, :, None]


if __name__ == "__main__":
    key = jax.random.PRNGKey(0)

    def make_params(k, C):
        k_wd, k_bd, k_w1, k_b1 = jax.random.split(k, 4)
        w_dil = jax.random.normal(k_wd, (C, C, 3), dtype=jnp.float32) * 0.1
        b_dil = jax.random.normal(k_bd, (C,), dtype=jnp.float32) * 0.1
        w_1x1 = jax.random.normal(k_w1, (C, C, 1), dtype=jnp.float32) * 0.1
        b_1x1 = jax.random.normal(k_b1, (C,), dtype=jnp.float32) * 0.1
        return w_dil, b_dil, w_1x1, b_1x1

    # Small configs exercising: multi-tile halos, tiny channels, dilation == halo,
    # and a sequence length that is not a multiple of 8 (partial edge blocks).
    configs = [
        dict(N=2, C=64, T=160, d=2, tile=64),
        dict(N=1, C=8,  T=16,  d=2, tile=2048),
        dict(N=2, C=16, T=100, d=8, tile=24),
    ]

    first_case = None
    for i, cfg in enumerate(configs):
        kx, kp, key = jax.random.split(key, 3)
        N, C, T, d = cfg["N"], cfg["C"], cfg["T"], cfg["d"]
        x = jax.random.normal(kx, (N, C, T), dtype=jnp.float32)
        params = make_params(kp, C)
        y_ref = _reference(x, *params, d)

        # f32 MXU path: tight check against the reference.
        fwd_f32 = jax.jit(functools.partial(
            dilated_residual_layer, dilation=d,
            time_tile=cfg["tile"], compute_dtype=jnp.float32))
        y32 = jax.block_until_ready(fwd_f32(x, *params))
        assert y32.shape == (N, C, T)
        assert jnp.allclose(y32, y_ref, atol=1e-4, rtol=1e-4), f"f32 mismatch cfg {i}"

        if first_case is None:
            first_case = (cfg, x, params, y_ref)

    # Default bf16-operand path (f32 accumulation): loose check on config 0.
    cfg, x, params, y_ref = first_case
    fwd_bf16 = jax.jit(functools.partial(
        dilated_residual_layer, dilation=cfg["d"], time_tile=cfg["tile"]))
    y16 = jax.block_until_ready(fwd_bf16(x, *params))
    assert y16.shape == (cfg["N"], cfg["C"], cfg["T"])
    assert jnp.allclose(y16, y_ref, atol=5e-2, rtol=5e-2), "bf16 mismatch vs reference"

    print("KERNEL_OK")
</pallas_src>

<mosaic_0001>
module attributes {stable_mosaic.version = 11 : i64} {
  func.func @_dilated_residual_kernel(%arg0: i32, %arg1: i32, %arg2: memref<1x8x64xf32, #tpu.memory_space<vmem>>, %arg3: memref<1x64x64xf32, #tpu.memory_space<vmem>>, %arg4: memref<1x8x64xf32, #tpu.memory_space<vmem>>, %arg5: memref<64x64xf32, #tpu.memory_space<vmem>>, %arg6: memref<64x64xf32, #tpu.memory_space<vmem>>, %arg7: memref<64x64xf32, #tpu.memory_space<vmem>>, %arg8: memref<1x64xf32, #tpu.memory_space<vmem>>, %arg9: memref<64x64xf32, #tpu.memory_space<vmem>>, %arg10: memref<1x64xf32, #tpu.memory_space<vmem>>, %arg11: memref<1x64x64xf32, #tpu.memory_space<vmem>>) attributes {dimension_semantics = [#tpu.dimension_semantics<parallel>, #tpu.dimension_semantics<parallel>], iteration_bounds = array<i64: 2, 3>, scalar_prefetch = 0 : i64, scratch_operands = 0 : i64, tpu.core_type = #tpu.core_type<tc>, window_params = [{transform_indices = @transform_0, window_bounds = array<i64: 1, 8, 64>}, {transform_indices = @transform_1, window_bounds = array<i64: 1, 64, 64>}, {transform_indices = @transform_2, window_bounds = array<i64: 1, 8, 64>}, {pipeline_mode = #tpu.pipeline_mode<synchronous>, transform_indices = @transform_3, window_bounds = array<i64: 64, 64>}, {pipeline_mode = #tpu.pipeline_mode<synchronous>, transform_indices = @transform_4, window_bounds = array<i64: 64, 64>}, {pipeline_mode = #tpu.pipeline_mode<synchronous>, transform_indices = @transform_5, window_bounds = array<i64: 64, 64>}, {pipeline_mode = #tpu.pipeline_mode<synchronous>, transform_indices = @transform_6, window_bounds = array<i64: 1, 64>}, {pipeline_mode = #tpu.pipeline_mode<synchronous>, transform_indices = @transform_7, window_bounds = array<i64: 64, 64>}, {pipeline_mode = #tpu.pipeline_mode<synchronous>, transform_indices = @transform_8, window_bounds = array<i64: 1, 64>}, {transform_indices = @transform_9, window_bounds = array<i64: 1, 64, 64>}]} {
    %c0 = arith.constant 0 : index
    %c0_0 = arith.constant 0 : index
    %c0_1 = arith.constant 0 : index
    %0 = vector.load %arg3[%c0, %c0_0, %c0_1] : memref<1x64x64xf32, #tpu.memory_space<vmem>>, vector<1x64x64xf32>
    %1 = vector.shape_cast %0 : vector<1x64x64xf32> to vector<64x64xf32>
    %c0_2 = arith.constant 0 : index
    %c0_3 = arith.constant 0 : index
    %c0_4 = arith.constant 0 : index
    %2 = vector.load %arg2[%c0_2, %c0_3, %c0_4] : memref<1x8x64xf32, #tpu.memory_space<vmem>>, vector<1x8x64xf32>
    %3 = vector.shape_cast %2 : vector<1x8x64xf32> to vector<8x64xf32>
    %c0_5 = arith.constant 0 : index
    %c0_6 = arith.constant 0 : index
    %c0_7 = arith.constant 0 : index
    %4 = vector.load %arg4[%c0_5, %c0_6, %c0_7] : memref<1x8x64xf32, #tpu.memory_space<vmem>>, vector<1x8x64xf32>
    %5 = vector.shape_cast %4 : vector<1x8x64xf32> to vector<8x64xf32>
    %6 = vector.extract_strided_slice %3 {offsets = [6, 0], sizes = [2, 64], strides = [1, 1]} : vector<8x64xf32> to vector<2x64xf32>
    %7 = vector.extract_strided_slice %1 {offsets = [0, 0], sizes = [62, 64], strides = [1, 1]} : vector<64x64xf32> to vector<62x64xf32>
    %8 = tpu.concatenate %6, %7 in 0 : vector<2x64xf32>, vector<62x64xf32> -> vector<64x64xf32>
    %9 = vector.extract_strided_slice %1 {offsets = [2, 0], sizes = [62, 64], strides = [1, 1]} : vector<64x64xf32> to vector<62x64xf32>
    %10 = vector.extract_strided_slice %5 {offsets = [0, 0], sizes = [2, 64], strides = [1, 1]} : vector<8x64xf32> to vector<2x64xf32>
    %11 = tpu.concatenate %9, %10 in 0 : vector<62x64xf32>, vector<2x64xf32> -> vector<64x64xf32>
    %12 = tpu.iota {dimensions = array<i32: 0>} : vector<64x1xi32>
    %c64_i32 = arith.constant 64 : i32
    %13 = arith.muli %arg1, %c64_i32 : i32
    %14 = vector.broadcast %13 : i32 to vector<64x1xi32>
    %15 = arith.addi %12, %14 : vector<64x1xi32>
    %c2_i32 = arith.constant 2 : i32
    %16 = vector.broadcast %c2_i32 : i32 to vector<64x1xi32>
    %17 = arith.cmpi sge, %15, %16 : vector<64x1xi32>
    %cst = arith.constant 0.000000e+00 : f32
    %18 = vector.shape_cast %17 : vector<64x1xi1> to vector<64x1xi1>
    %19 = vector.broadcast %18 : vector<64x1xi1> to vector<64x64xi1>
    %20 = vector.broadcast %cst : f32 to vector<64x64xf32>
    %21 = arith.select %19, %8, %20 : vector<64x64xi1>, vector<64x64xf32>
    %c2_i32_8 = arith.constant 2 : i32
    %22 = vector.broadcast %c2_i32_8 : i32 to vector<64x1xi32>
    %23 = arith.addi %15, %22 : vector<64x1xi32>
    %c160_i32 = arith.constant 160 : i32
    %24 = vector.broadcast %c160_i32 : i32 to vector<64x1xi32>
    %25 = arith.cmpi slt, %23, %24 : vector<64x1xi32>
    %cst_9 = arith.constant 0.000000e+00 : f32
    %26 = vector.shape_cast %25 : vector<64x1xi1> to vector<64x1xi1>
    %27 = vector.broadcast %26 : vector<64x1xi1> to vector<64x64xi1>
    %28 = vector.broadcast %cst_9 : f32 to vector<64x64xf32>
    %29 = arith.select %27, %11, %28 : vector<64x64xi1>, vector<64x64xf32>
    %c0_10 = arith.constant 0 : index
    %c0_11 = arith.constant 0 : index
    %30 = vector.load %arg6[%c0_10, %c0_11] : memref<64x64xf32, #tpu.memory_space<vmem>>, vector<64x64xf32>
    %cst_12 = arith.constant dense<0.000000e+00> : vector<64x64xf32>
    %31 = tpu.matmul %1, %30, %cst_12 {dimension_numbers = #tpu.dot_dimension_numbers<[1], [0], [0], [1], [0, 0, 1, 1], [], []>} : vector<64x64xf32>, vector<64x64xf32>, vector<64x64xf32> -> vector<64x64xf32>
    %c0_13 = arith.constant 0 : index
    %c0_14 = arith.constant 0 : index
    %32 = vector.load %arg5[%c0_13, %c0_14] : memref<64x64xf32, #tpu.memory_space<vmem>>, vector<64x64xf32>
    %cst_15 = arith.constant dense<0.000000e+00> : vector<64x64xf32>
    %33 = tpu.matmul %21, %32, %cst_15 {dimension_numbers = #tpu.dot_dimension_numbers<[1], [0], [0], [1], [0, 0, 1, 1], [], []>} : vector<64x64xf32>, vector<64x64xf32>, vector<64x64xf32> -> vector<64x64xf32>
    %34 = arith.addf %31, %33 : vector<64x64xf32>
    %c0_16 = arith.constant 0 : index
    %c0_17 = arith.constant 0 : index
    %35 = vector.load %arg7[%c0_16, %c0_17] : memref<64x64xf32, #tpu.memory_space<vmem>>, vector<64x64xf32>
    %cst_18 = arith.constant dense<0.000000e+00> : vector<64x64xf32>
    %36 = tpu.matmul %29, %35, %cst_18 {dimension_numbers = #tpu.dot_dimension_numbers<[1], [0], [0], [1], [0, 0, 1, 1], [], []>} : vector<64x64xf32>, vector<64x64xf32>, vector<64x64xf32> -> vector<64x64xf32>
    %37 = arith.addf %34, %36 : vector<64x64xf32>
    %c0_19 = arith.constant 0 : index
    %c0_20 = arith.constant 0 : index
    %38 = vector.load %arg8[%c0_19, %c0_20] : memref<1x64xf32, #tpu.memory_space<vmem>>, vector<1x64xf32>
    %39 = vector.broadcast %38 : vector<1x64xf32> to vector<64x64xf32>
    %40 = arith.addf %37, %39 : vector<64x64xf32>
    %cst_21 = arith.constant 0.000000e+00 : f32
    %41 = vector.broadcast %cst_21 : f32 to vector<64x64xf32>
    %42 = arith.maximumf %40, %41 : vector<64x64xf32>
    %c0_22 = arith.constant 0 : index
    %c0_23 = arith.constant 0 : index
    %43 = vector.load %arg9[%c0_22, %c0_23] : memref<64x64xf32, #tpu.memory_space<vmem>>, vector<64x64xf32>
    %cst_24 = arith.constant dense<0.000000e+00> : vector<64x64xf32>
    %44 = tpu.matmul %42, %43, %cst_24 {dimension_numbers = #tpu.dot_dimension_numbers<[1], [0], [0], [1], [0, 0, 1, 1], [], []>} : vector<64x64xf32>, vector<64x64xf32>, vector<64x64xf32> -> vector<64x64xf32>
    %c0_25 = arith.constant 0 : index
    %c0_26 = arith.constant 0 : index
    %45 = vector.load %arg10[%c0_25, %c0_26] : memref<1x64xf32, #tpu.memory_space<vmem>>, vector<1x64xf32>
    %46 = vector.broadcast %45 : vector<1x64xf32> to vector<64x64xf32>
    %47 = arith.addf %44, %46 : vector<64x64xf32>
    %48 = arith.addf %1, %47 : vector<64x64xf32>
    %c0_27 = arith.constant 0 : index
    %c0_28 = arith.constant 0 : index
    %c0_29 = arith.constant 0 : index
    %49 = vector.load %arg11[%c0_27, %c0_28, %c0_29] : memref<1x64x64xf32, #tpu.memory_space<vmem>>, vector<1x64x64xf32>
    %50 = vector.shape_cast %49 : vector<1x64x64xf32> to vector<64x64xf32>
    %51 = vector.shape_cast %48 : vector<64x64xf32> to vector<1x64x64xf32>
    tpu.vector_store %arg11[%c0_27, %c0_28, %c0_29], %51 {strides = array<i32>} : memref<1x64x64xf32, #tpu.memory_space<vmem>>, vector<1x64x64xf32>,
    return
  }
  func.func @transform_0(%arg0: i32, %arg1: i32) -> (i32, i32, i32) {
    %c8_i32 = arith.constant 8 : i32
    %0 = arith.muli %arg1, %c8_i32 : i32
    %c1_i32 = arith.constant 1 : i32
    %1 = arith.subi %0, %c1_i32 : i32
    %c0_i32 = arith.constant 0 : i32
    %2 = arith.maxsi %1, %c0_i32 : i32
    %c0_i32_0 = arith.constant 0 : i32
    %c0_i32_1 = arith.constant 0 : i32
    return %arg0, %2, %c0_i32_0 : i32, i32, i32
  }
  func.func @transform_1(%arg0: i32, %arg1: i32) -> (i32, i32, i32) {
    %c0_i32 = arith.constant 0 : i32
    %c0_i32_0 = arith.constant 0 : i32
    return %arg0, %arg1, %c0_i32 : i32, i32, i32
  }
  func.func @transform_2(%arg0: i32, %arg1: i32) -> (i32, i32, i32) {
    %c1_i32 = arith.constant 1 : i32
    %0 = arith.addi %arg1, %c1_i32 : i32
    %c8_i32 = arith.constant 8 : i32
    %1 = arith.muli %0, %c8_i32 : i32
    %c19_i32 = arith.constant 19 : i32
    %2 = arith.minsi %1, %c19_i32 : i32
    %c0_i32 = arith.constant 0 : i32
    %c0_i32_0 = arith.constant 0 : i32
    return %arg0, %2, %c0_i32 : i32, i32, i32
  }
  func.func @transform_3(%arg0: i32, %arg1: i32) -> (i32, i32) {
    %c0_i32 = arith.constant 0 : i32
    %c0_i32_0 = arith.constant 0 : i32
    %c0_i32_1 = arith.constant 0 : i32
    return %c0_i32, %c0_i32_0 : i32, i32
  }
  func.func @transform_4(%arg0: i32, %arg1: i32) -> (i32, i32) {
    %c0_i32 = arith.constant 0 : i32
    %c0_i32_0 = arith.constant 0 : i32
    %c0_i32_1 = arith.constant 0 : i32
    return %c0_i32, %c0_i32_0 : i32, i32
  }
  func.func @transform_5(%arg0: i32, %arg1: i32) -> (i32, i32) {
    %c0_i32 = arith.constant 0 : i32
    %c0_i32_0 = arith.constant 0 : i32
    %c0_i32_1 = arith.constant 0 : i32
    return %c0_i32, %c0_i32_0 : i32, i32
  }
  func.func @transform_6(%arg0: i32, %arg1: i32) -> (i32, i32) {
    %c0_i32 = arith.constant 0 : i32
    %c0_i32_0 = arith.constant 0 : i32
    %c0_i32_1 = arith.constant 0 : i32
    return %c0_i32, %c0_i32_0 : i32, i32
  }
  func.func @transform_7(%arg0: i32, %arg1: i32) -> (i32, i32) {
    %c0_i32 = arith.constant 0 : i32
    %c0_i32_0 = arith.constant 0 : i32
    %c0_i32_1 = arith.constant 0 : i32
    return %c0_i32, %c0_i32_0 : i32, i32
  }
  func.func @transform_8(%arg0: i32, %arg1: i32) -> (i32, i32) {
    %c0_i32 = arith.constant 0 : i32
    %c0_i32_0 = arith.constant 0 : i32
    %c0_i32_1 = arith.constant 0 : i32
    return %c0_i32, %c0_i32_0 : i32, i32
  }
  func.func @transform_9(%arg0: i32, %arg1: i32) -> (i32, i32, i32) {
    %c0_i32 = arith.constant 0 : i32
    %c0_i32_0 = arith.constant 0 : i32
    return %arg0, %arg1, %c0_i32 : i32, i32, i32
  }
}

</mosaic_0001>

<bundles_post_ra>
// kernel: dilated_residual_layer.1
= control target key start
LH: loop header
LB: loop body
LE: loop exit
PB: predicated region body
PF: predicated region fallthrough
CT: control target
= control target key end

     0   :  { %s2198_s30 = smov 0   ;;  %s2200_s10 = smov 0   ;;  %s2680_s0 = inlined_call_operand.vmem [shape: f32[2,160,64], index: 0, kind: input, shape index: {}, may-alias: {0,1,2}]   ;;  %s2681_s1 = inlined_call_operand.vmem [shape: f32[2,160,64], index: 1, kind: input, shape index: {}, may-alias: {0,1,2}]   ;;  %s2682_s2 = inlined_call_operand.vmem [shape: f32[2,160,64], index: 2, kind: input, shape index: {}, may-alias: {0,1,2}]   ;;  %s2683_s3 = inlined_call_operand.vmem [shape: f32[64,64], index: 3, kind: input, shape index: {}]   ;;  %s2684_s4 = inlined_call_operand.vmem [shape: f32[64,64], index: 4, kind: input, shape index: {}]   ;;  %s2685_s5 = inlined_call_operand.vmem [shape: f32[64,64], index: 5, kind: input, shape index: {}]   ;;  %s2686_s6 = inlined_call_operand.vmem [shape: f32[1,64], index: 6, kind: input, shape index: {}]   ;;  %s2687_s7 = inlined_call_operand.vmem [shape: f32[64,64], index: 7, kind: input, shape index: {}]   ;;  %s2688_s8 = inlined_call_operand.vmem [shape: f32[1,64], index: 8, kind: input, shape index: {}]   ;;  %s2689_s9 = inlined_call_operand.vmem [shape: f32[2,160,64], index: 9, kind: output, shape index: {}]  }
   0x1   :  { %s2202_s11 = smov 0   ;;  %s2204_s12 = smov 0  }
   0x2   :  { %s2206_s13 = smov 0   ;;  %s2208_s14 = smov 0  }
   0x3   :  { %s2210_s15 = smov 0  }
   0x4 LB: > { %2694 = sst [smem:[#allocation3_spill]] %s2106_s13  ;;  %s28_s16 = sadd.s32 1, %s2106_s13  ;;  %s2114_s15 = sphi %s2210_s15, %s19_s15   ;;  %s2110_s14 = sphi %s2208_s14, %s2706_s14   ;;  %s2106_s13 = sphi %s2206_s13, %s2705_s13   ;;  %s2102_s12 = sphi %s2204_s12, %s2704_s12   ;;  %s2098_s11 = sphi %s2202_s11, %s2703_s11   ;;  %s2094_s10 = sphi %s2200_s10, %s2708_s10   ;;  %s2090_s30 = sphi %s2198_s30, %s2707_s30  }
   0x5   : > { %2695 = sst [smem:[#allocation4_spill]] %s2110_s14  ;;  %p29_p0 = scmp.ge.s32.totalorder %s28_s16, 3 }
   0x6   : > { %s31_s17 = sadd.s32 1, %s2110_s14  ;;  %s1561_s18 = sadd.s32 4294967295, %s2114_s15  }
   0x7   : > { %p276_p1 = scmp.ne.s32.totalorder %s2094_s10, %s2090_s30  ;;  %s2710_s16 = smov (%p29_p0, %s28_s16), 0 }
   0x8   : > { %2696 = sst [smem:[#allocation5_spill]] %s2710_s16  ;;  %s2712_s17 = smov (!%p29_p0, %s31_s17), %s2110_s14 }
   0x9   : > { %s262_s19 = ssub.s32 %s2106_s13, %s2710_s16  ;;  %p277_p2 = scmp.eq.s32.totalorder %s1561_s18, 5 }
   0xa   : > { %p33_p3 = scmp.ge.s32.totalorder %s2712_s17, 2  ;;  %p1571_p4 = scmp.ge.s32.totalorder %s2114_s15, 1 }
   0xb   : > { %p2244_p5 = por %p277_p2, %p276_p1  ;;  %p378_p6 = scmp.lt.s32.totalorder %s2114_s15, 7 }
   0xc   : > { %s2714_s17 = smov (%p33_p3, %s2712_s17), 0  ;;  %s266_s23 = sadd.s32 1, %s2094_s10 }
   0xd   : > { %2698 = sst [smem:[#allocation6_spill]] %s2714_s17  ;;  %p379_p7 = pnand %p1571_p4, %p378_p6 }
   0xe   : > { %s261_s21 = ssub.s32 %s2110_s14, %s2714_s17  ;;  %v665_v0 = vld [vmem:[%s2684_s4] sm:$0xff] (!%p379_p7)  ;;  %v666_v1 = vld [vmem:[%s2684_s4 + $0x8] sm:$0xff] (!%p379_p7)  ;;  %v667_v2 = vld [vmem:[%s2684_s4 + $0x10] sm:$0xff] (!%p379_p7)  ;;  %p449_p9 = scmp.lt.s32.totalorder (!%p379_p7), %s2102_s12, 1  ;;  %v574_v5 = vlaneseq (!%p379_p7)  ;;  %vm681_vm0 = vcmask (!%p379_p7), 523264   ;;  %vm521_vm1 = vcmask (!%p379_p7), 1041408  }
   0xf   : > { %s263_s22 = sor.u32 %s262_s19, %s261_s21  ;;  %382 = sbr.rel (%p379_p7) target bundleno = 549 (0x225), region = 56  ;;  %v1842_v3 = vpack.c.bf16 (!%p379_p7), %v666_v1, %v665_v0  ;;  %v668_v4 = vld [vmem:[%s2684_s4 + $0x18] sm:$0xff] (!%p379_p7)  ;;  %v669_v7 = vld [vmem:[%s2684_s4 + $0x20] sm:$0xff] (!%p379_p7)  ;;  %v670_v8 = vld [vmem:[%s2684_s4 + $0x28] sm:$0xff] (!%p379_p7)  ;;  %vm546_vm2 = vcmask (!%p379_p7), 1045504  }
  0x10   : > { %p264_p8 = scmp.eq.s32.totalorder %s263_s22, 0  ;;  %s2267_s19 = sshll.u32 (!%p379_p7), %s2098_s11, 3  ;;  %v1846_v6 = vpack.c.bf16 (!%p379_p7), %v668_v4, %v667_v2  ;;  %v673_v9 = vld [vmem:[%s2683_s3] sm:$0xff] (!%p379_p7)  ;;  %v674_v10 = vld [vmem:[%s2683_s3 + $0x8] sm:$0xff] (!%p379_p7)  ;;  %v675_v12 = vld [vmem:[%s2683_s3 + $0x10] sm:$0xff] (!%p379_p7)  ;;  %v1850_v14 = vpack.c.bf16 (!%p379_p7), %v670_v8, %v669_v7  ;;  %v2306_v18 = vshrl.u32 (!%p379_p7), %v574_v5, 7 }
  0x11   : > { %p468_p10 = scmp.lt.s32.totalorder (!%p379_p7), %s2267_s19, 19  ;;  %1843 = vmatprep.subr.bf16.mxu0 (!%p379_p7), %v1842_v3  ;;  %v1826_v11 = vpack.c.bf16 (!%p379_p7), %v674_v10, %v673_v9  ;;  %v676_v13 = vld [vmem:[%s2683_s3 + $0x18] sm:$0xff] (!%p379_p7)  ;;  %v677_v16 = vld [vmem:[%s2683_s3 + $0x20] sm:$0xff] (!%p379_p7)  ;;  %v678_v17 = vld [vmem:[%s2683_s3 + $0x28] sm:$0xff] (!%p379_p7)  ;;  %s1588_s17 = sshll.u32 (!%p379_p7), %s2098_s11, 6 }
  0x12   : > { %s2255_s24 = scalar_select %p264_p8, %s2094_s10, %s266_s23  }
  0x13   : > { %s2275_s23 = sadd.s32 (!%p379_p7), 4294967295, %s2267_s19  ;;  %1845 = vmatpush3.bf16.msra.mxu0 (!%p379_p7), %v1842_v3  ;;  %v1830_v15 = vpack.c.bf16 (!%p379_p7), %v676_v13, %v675_v12  ;;  %v671_v19 = vld [vmem:[%s2684_s4 + $0x30] sm:$0xff] (!%p379_p7)  ;;  %v672_v20 = vld [vmem:[%s2684_s4 + $0x38] sm:$0xff] (!%p379_p7)  ;;  %1827 = vmatprep.subr.bf16.mxu1 (!%p379_p7), %v1826_v11  ;;  %v1834_v21 = vpack.c.bf16 (!%p379_p7), %v678_v17, %v677_v16  ;;  %v2334_v26 = vstv (!%p379_p7), %s1588_s17  ;;  %v576_v27 = vadd.s32 (!%p379_p7), 8, %v2306_v18  ;;  %v932_v28 = vld [vmem:[%s2685_s5] sm:$0xff] (!%p379_p7) }
  0x14   : > { %1847 = vmatprep.subr.bf16.mxu0 (!%p379_p7), %v1846_v6  ;;  %p447_p11 = scmp.gt.s32.totalorder (!%p379_p7), %s2275_s23, 0  ;;  %1829 = vmatpush3.bf16.msra.mxu1 (!%p379_p7), %v1826_v11  ;;  %p1575_p12 = scmp.lt.s32.totalorder (!%p379_p7), %s2275_s23, 19  ;;  %v1854_v22 = vpack.c.bf16 (!%p379_p7), %v672_v20, %v671_v19  ;;  %v679_v24 = vld [vmem:[%s2683_s3 + $0x30] sm:$0xff] (!%p379_p7)  ;;  %v680_v25 = vld [vmem:[%s2683_s3 + $0x38] sm:$0xff] (!%p379_p7)  ;;  %v933_v29 = vld [vmem:[%s2685_s5 + $0x8] sm:$0xff] (!%p379_p7)  ;;  %v577_v31 = vadd.s32 (!%p379_p7), 16, %v2306_v18  ;;  %v585_v36 = vadd.s32 (!%p379_p7), %v2334_v26, %v2306_v18 }
  0x15   : > { %1831 = vmatprep.subr.bf16.mxu1 (!%p379_p7), %v1830_v15  ;;  %v934_v30 = vld [vmem:[%s2685_s5 + $0x10] sm:$0xff] (!%p379_p7)  ;;  %v935_v33 = vld [vmem:[%s2685_s5 + $0x18] sm:$0xff] (!%p379_p7)  ;;  %v936_v34 = vld [vmem:[%s2685_s5 + $0x20] sm:$0xff] (!%p379_p7)  ;;  %v1838_v35 = vpack.c.bf16 (!%p379_p7), %v680_v25, %v679_v24  ;;  %v578_v37 = vadd.s32 (!%p379_p7), 24, %v2306_v18  ;;  %v1858_v39 = vpack.c.bf16 (!%p379_p7), %v933_v29, %v932_v28  ;;  %v2376_v44 = vadd.s32 (!%p379_p7), %v2334_v26, %v576_v27 }
  0x16   : > { %s450_s29 = scalar_select %p449_p9, %s2102_s12, 1  ;;  %v937_v40 = vld [vmem:[%s2685_s5 + $0x28] sm:$0xff]  ;;  %v938_v41 = vld [vmem:[%s2685_s5 + $0x30] sm:$0xff]  ;;  %v939_v42 = vld [vmem:[%s2685_s5 + $0x38] sm:$0xff]  ;;  %v1862_v49 = vpack.c.bf16 %v935_v33, %v934_v30  ;;  %v2396_v50 = vadd.s32 %v2334_v26, %v577_v31  ;;  %v579_v51 = vadd.s32 32, %v2306_v18  ;;  %vm593_vm3 = vcmp.ge.s32.totalorder %v585_v36, 2 }
  0x17   : > { %s469_s21 = scalar_select %p468_p10, %s2267_s19, 19  ;;  %1849 = vmatpush3.bf16.msra.mxu0 %v1846_v6  ;;  %v1100_v46 = vld [vmem:[%s2687_s7] sm:$0xff]  ;;  %v1101_v47 = vld [vmem:[%s2687_s7 + $0x8] sm:$0xff]  ;;  %v2402_v53 = vpack.c.bf16 %v937_v40, %v936_v34  ;;  %v2404_v54 = vpack.c.bf16 %v939_v42, %v938_v41  ;;  %v2410_v55 = vadd.s32 %v2334_v26, %v578_v37  ;;  %vm594_vm4 = vcmp.ge.s32.totalorder %v2376_v44, 2  ;;  %v1103_v24 = vld [vmem:[%s2687_s7 + $0x18] sm:$0xff] }
  0x18   : > { %s2291_s25 = smul.u32 20, %s450_s29  ;;  %1851 = vmatprep.subr.bf16.mxu0 %v1850_v14  ;;  %s1647_s29 = sadd.s32 8, %s2267_s19  ;;  %1833 = vmatpush3.bf16.msra.mxu1 %v1830_v15  ;;  %v1874_v59 = vpack.c.bf16 %v1101_v47, %v1100_v46  ;;  %v2426_v0 = vadd.s32 2, %v585_v36  ;;  %vm595_vm5 = vcmp.ge.s32.totalorder %v2396_v50, 2  ;;  %v2434_v3 = vadd.s32 %v2334_v26, %v579_v51 }
  0x19   : > { %s448_s14 = scalar_select %p447_p11, %s2275_s23, 0  ;;  %1835 = vmatprep.subr.bf16.mxu1 %v1834_v21  ;;  %vm596_vm6 = vcmp.ge.s32.totalorder %v2410_v55, 2  ;;  %v580_v17 = vadd.s32 40, %v2306_v18  ;;  %v582_v28 = vadd.s32 56, %v2306_v18  ;;  %v626_v29 = vadd.s32 2, %v2376_v44 }
  0x1a   : > { %s471_s28 = sadd.s32 %s2291_s25, %s469_s21  ;;  %p2380_p13 = scmp.lt.s32.totalorder %s1647_s29, 19  ;;  %vm597_vm7 = vcmp.ge.s32.totalorder %v2434_v3, 2  ;;  %vm633_vm8 = vcmp.lt.s32.totalorder %v2426_v0, 160  ;;  %v627_v30 = vadd.s32 2, %v2396_v50  ;;  %v628_v41 = vadd.s32 2, %v2410_v55 }
  0x1b   : > { %s1582_s16 = sshll.u32 %s471_s28, 3  ;;  %1853 = vmatpush3.bf16.msra.mxu0 %v1850_v14  ;;  %s2716_s14 = smov (!%p1575_p12, %s448_s14), 19  ;;  %v590_v27 = vadd.s32 %v2334_v26, %v580_v17  ;;  %vm634_vm11 = vcmp.lt.s32.totalorder %v626_v29, 160  ;;  %v629_v44 = vadd.s32 2, %v2434_v3 }
  0x1c   : > { %s2319_s13 = scalar_lea.vmem %s2681_s1, %s1582_s16  ;;  %1855 = vmatprep.subr.bf16.mxu0 %v1854_v22  ;;  %s454_s22 = sadd.s32 %s2291_s25, %s2716_s14  ;;  %1837 = vmatpush3.bf16.msra.mxu1 %v1834_v21  ;;  %v581_v21 = vadd.s32 48, %v2306_v18  ;;  %v592_v18 = vadd.s32 %v2334_v26, %v582_v28  ;;  %vm635_vm13 = vcmp.lt.s32.totalorder %v627_v30, 160  ;;  %vm636_vm14 = vcmp.lt.s32.totalorder %v628_v41, 160 }
  0x1d   : > { %v2323_v23 = vld [vmem:[%s2319_s13] sm:$0xff]  ;;  %v2351_v32 = vld [vmem:[%s2319_s13 + $0x8] sm:$0xff]  ;;  %v2385_v45 = vld [vmem:[%s2319_s13 + $0x10] sm:$0xff]  ;;  %s1580_s18 = sshll.u32 %s454_s22, 3  ;;  %1839 = vmatprep.subr.bf16.mxu1 %v1838_v35  ;;  %s2718_s29 = smov (!%p2380_p13, %s1647_s29), 19  ;;  %vm598_vm9 = vcmp.ge.s32.totalorder %v590_v27, 2 }
  0x1e   : > { %1758 = vmatprep.mubr.msk.f32.mxu0 %vm681_vm0, %v2323_v23  ;;  %v523_v38 = vrot.slane %v2351_v32, 6  ;;  %v522_v43 = vrot.slane %v2323_v23, 6  ;;  %v525_v48 = vrot.slane %v2385_v45, 6  ;;  %v2400_v52 = vld [vmem:[%s2319_s13 + $0x18] sm:$0xff]  ;;  %s456_s21 = scalar_lea.vmem %s2680_s0, %s1580_s18  ;;  %v547_v60 = vrot.slane %v2323_v23, 2  ;;  %v2424_v62 = vld [vmem:[%s2319_s13 + $0x20] sm:$0xff] }
  0x1f   : > { %1857 = vmatpush3.bf16.msra.mxu0 %v1854_v22  ;;  %v527_v56 = vrot.slane %v2400_v52, 6  ;;  %v508_v57 = vld [vmem:[%s456_s21] sm:$0xff]  ;;  %v548_v61 = vrot.slane %v2351_v32, 2  ;;  %v529_v1 = vrot.slane %v2424_v62, 6  ;;  %v550_v4 = vrot.slane %v2385_v45, 2  ;;  %v2441_v6 = vld [vmem:[%s2319_s13 + $0x28] sm:$0xff] }
  0x20   : > { %1859 = vmatprep.subr.bf16.mxu0 %v1858_v39  ;;  %v524_v58 = vsel %vm521_vm1, %v522_v43, %v523_v38  ;;  %v511_v63 = vrot.slane %v508_v57, 6  ;;  %1841 = vmatpush3.bf16.msra.mxu1 %v1838_v35  ;;  %v526_v2 = vsel %vm521_vm1, %v523_v38, %v525_v48  ;;  %v552_v5 = vrot.slane %v2400_v52, 2  ;;  %v2448_v10 = vld [vmem:[%s2319_s13 + $0x30] sm:$0xff]  ;;  %v2451_v11 = vld [vmem:[%s2319_s13 + $0x38] sm:$0xff]  ;;  %s2720_s29 = smov (!%p2380_p13, %s2718_s29), 19  ;;  %s1907_s18 = smul.u32 (%p2244_p5), 20, %s2102_s12 }
  0x21   : > { %v618_v8 = vsel %vm594_vm4, %v524_v58, 0.0  ;;  %v531_v9 = vrot.slane %v2441_v6, 6  ;;  %v528_v13 = vsel %vm521_vm1, %v525_v48, %v527_v56  ;;  %1875 = vmatprep.subr.bf16.mxu1 %v1874_v59  ;;  %v533_v14 = vrot.slane %v2448_v10, 6  ;;  %v1102_v22 = vld [vmem:[%s2687_s7 + $0x10] sm:$0xff]  ;;  %s2494_s26 = sadd.s32 %s2291_s25, %s2720_s29 }
  0x22   : > { %1759 = vmatmul.mubr.msk.f32.vlgmr.msra.gmra.mrb[0].mxu0 %vm681_vm0, %v2351_v32  ;;  %v545_v7 = vsel %vm521_vm1, %v511_v63, %v522_v43  ;;  %v535_v15 = vrot.slane %v2451_v11, 6  ;;  %v619_v16 = vsel %vm595_vm5, %v526_v2, 0.0  ;;  %v549_v19 = vsel %vm546_vm2, %v547_v60, %v548_v61  ;;  %s1587_s25 = sshll.u32 %s2494_s26, 3  ;;  %s1274_s14 = sadd.s32 (%p2244_p5), %s1907_s18, %s2267_s19 }
  0x23   : > { %1861 = vmatpush3.bf16.msra.mxu0 %v1858_v39  ;;  %1761 = vmatprep.mubr.msk.f32.mxu0 %vm681_vm0, %v2385_v45  ;;  %v617_v12 = vsel %vm593_vm3, %v545_v7, 0.0  ;;  %v530_v20 = vsel %vm521_vm1, %v527_v56, %v529_v1  ;;  %v620_v25 = vsel %vm596_vm6, %v528_v13, 0.0  ;;  %v532_v31 = vsel %vm521_vm1, %v529_v1, %v531_v9  ;;  %s490_s28 = scalar_lea.vmem %s2682_s2, %s1587_s25  ;;  %v1105_v7 = vld [vmem:[%s2687_s7 + $0x28] sm:$0xff]  ;;  %s442_s25 = sand.u32 1, %s2090_s30  }
  0x24   : > { %1863 = vmatprep.subr.bf16.mxu0 %v1862_v49  ;;  %1730 = vmatprep.mubr.msk.f32.mxu1 %vm681_vm0, %v617_v12  ;;  %v591_v33 = vadd.s32 %v2334_v26, %v581_v21  ;;  %v621_v34 = vsel %vm597_vm7, %v530_v20, 0.0  ;;  %v1878_v35 = vpack.c.bf16 %v1103_v24, %v1102_v22  ;;  %v554_v36 = vrot.slane %v2424_v62, 2  ;;  %v509_v57 = vld [vmem:[%s490_s28] sm:$0xff]  ;;  %v1107_v12 = vld [vmem:[%s2687_s7 + $0x38] sm:$0xff]  ;;  %s1572_s28 = sshll.u32 %s442_s25, 6  ;;  %s1268_s30 = ssub.s32 (%p2244_p5), 20, %s2267_s19 }
  0x25   : > { %1731 = vmatmul.mubr.msk.f32.vlgmr.msra.gmra.mrb[0].mxu1 %vm681_vm0, %v618_v8  ;;  %v534_v37 = vsel %vm521_vm1, %v531_v9, %v533_v14  ;;  %v556_v38 = vrot.slane %v2441_v6, 2  ;;  %v657_v26 = vsel %vm633_vm8, %v549_v19, 0.0  ;;  %v551_v39 = vsel %vm546_vm2, %v548_v61, %v550_v4  ;;  %v1106_v9 = vld [vmem:[%s2687_s7 + $0x30] sm:$0xff]  ;;  %v1613_v22 = vld [vmem:[%s2686_s6] ss:$0 sm:$0xff]  ;;  %s2583_s16 = scalar_lea.vmem [#allocation2], %s1572_s28  }
  0x26   : > { %1762 = vmatmul.mubr.msk.f32.gmra.mrb[2].mxu0 %vm681_vm0, %v2400_v52  ;;  %1733 = vmatprep.mubr.msk.f32.mxu1 %vm681_vm0, %v619_v16  ;;  %vm599_vm10 = vcmp.ge.s32.totalorder %v591_v33, 2  ;;  %v622_v40 = vsel %vm598_vm9, %v532_v31, 0.0  ;;  %v536_v42 = vsel %vm521_vm1, %v533_v14, %v535_v15  ;;  %vm600_vm12 = vcmp.ge.s32.totalorder %v592_v18, 2  ;;  %p1269_p0 = scmp.lt.s32.totalorder (%p2244_p5), %s1268_s30, 8  ;;  %s1627_s11 = sshll.u32 (%p2244_p5), %s1274_s14, 3 }
  0x27   : > { %1865 = vmatpush3.bf16.msra.mxu0 %v1862_v49  ;;  %1764 = vmatprep.mubr.msk.f32.mxu0 %vm681_vm0, %v2424_v62  ;;  %v553_v43 = vsel %vm546_vm2, %v550_v4, %v552_v5  ;;  %v623_v46 = vsel %vm599_vm10, %v534_v37, 0.0  ;;  %v558_v47 = vrot.slane %v2448_v10, 2  ;;  %v658_v48 = vsel %vm634_vm11, %v551_v39, 0.0  ;;  %s2618_s17 = scalar_lea.vmem (%p2244_p5), %s2689_s9, %s1627_s11  }
  0x28   : > { %1867 = vmatprep.subr.bf16.mxu0 %v2402_v53  ;;  %1877 = vmatpush3.bf16.msra.mxu1 %v1874_v59  ;;  %v624_v49 = vsel %vm600_vm12, %v536_v42, 0.0  ;;  %v659_v50 = vsel %vm635_vm13, %v553_v43, 0.0  ;;  %v555_v51 = vsel %vm546_vm2, %v552_v5, %v554_v36  ;;  %v560_v55 = vrot.slane %v2451_v11, 2  ;;  %v1104_v5 = vld [vmem:[%s2687_s7 + $0x20] sm:$0xff] }
  0x29   : > { %1734 = vmatmul.mubr.msk.f32.gmra.mrb[2].mxu1 %vm681_vm0, %v620_v25  ;;  %1879 = vmatprep.subr.bf16.mxu1 %v1878_v35  ;;  %v557_v56 = vsel %vm546_vm2, %v554_v36, %v556_v38  ;;  %vm637_vm15 = vcmp.lt.s32.totalorder %v629_v44, 160  ;;  %v660_v58 = vsel %vm636_vm14, %v555_v51, 0.0  ;;  %v559_v59 = vsel %vm546_vm2, %v556_v38, %v558_v47 }
  0x2a   : > { %1765 = vmatmul.mubr.msk.f32.gmra.mrb[4].mxu0 %vm681_vm0, %v2441_v6  ;;  %1736 = vmatprep.mubr.msk.f32.mxu1 %vm681_vm0, %v621_v34  ;;  %v661_v60 = vsel %vm637_vm15, %v557_v56, 0.0  ;;  %v571_v61 = vrot.slane %v509_v57, 2  ;;  %v632_v63 = vadd.s32 2, %v592_v18  ;;  %v561_v0 = vsel %vm546_vm2, %v558_v47, %v560_v55 }
  0x2b   : > { %1869 = vmatpush3.bf16.msra.mxu0 %v2402_v53  ;;  %1767 = vmatprep.mubr.msk.f32.mxu0 %vm681_vm0, %v2448_v10  ;;  %v630_v53 = vadd.s32 2, %v590_v27  ;;  %v1882_v8 = vpack.c.bf16 %v1105_v7, %v1104_v5  ;;  %v1886_v13 = vpack.c.bf16 %v1107_v12, %v1106_v9 }
  0x2c   : > { %1871 = vmatprep.subr.bf16.mxu0 %v2404_v54  ;;  %1881 = vmatpush3.bf16.msra.mxu1 %v1878_v35  ;;  %v573_v3 = vsel %vm546_vm2, %v560_v55, %v571_v61  ;;  %vm640_vm4 = vcmp.lt.s32.totalorder %v632_v63, 160 }
  0x2d   : > { %1737 = vmatmul.mubr.msk.f32.gmra.mrb[4].mxu1 %vm681_vm0, %v622_v40  ;;  %vm638_vm1 = vcmp.lt.s32.totalorder %v630_v53, 160  ;;  %v664_v4 = vsel %vm640_vm4, %v573_v3, 0.0  ;;  %1883 = vmatprep.subr.bf16.mxu1 %v1882_v8 }
  0x2e   : > { %1768 = vmatmul.mubr.msk.f32.gmra.mrb[6].mxu0 %vm681_vm0, %v2451_v11  ;;  %1739 = vmatprep.mubr.msk.f32.mxu1 %vm681_vm0, %v623_v46  ;;  %v662_v1 = vsel %vm638_vm1, %v559_v59, 0.0  ;;  %v1614_v59 = vld [vmem:[%s2688_s8] ss:$0 sm:$0xff] }
  0x2f   : > { %1873 = vmatpush3.bf16.msra.mxu0 %v2404_v54  ;;  %1786 = vmatprep.mubr.msk.f32.mxu0 %vm681_vm0, %v657_v26  ;;  %v631_v54 = vadd.s32 2, %v591_v33 }
  0x30   : > { %1885 = vmatpush3.bf16.msra.mxu1 %v1882_v8 }
  0x31   : > { %1740 = vmatmul.mubr.msk.f32.gmra.mrb[6].mxu1 %vm681_vm0, %v624_v49  ;;  %vm639_vm3 = vcmp.lt.s32.totalorder %v631_v54, 160  ;;  %1887 = vmatprep.subr.bf16.mxu1 %v1886_v13 }
  0x32   : > { %1787 = vmatmul.mubr.msk.f32.vlgmr.msra.gmra.mrb[0].mxu0 %vm681_vm0, %v658_v48  ;;  %v663_v2 = vsel %vm639_vm3, %v561_v0, 0.0 }
  0x33   : > { %1789 = vmatprep.mubr.msk.f32.mxu0 %vm681_vm0, %v659_v50 }
  0x34   : > { %1889 = vmatpush3.bf16.msra.mxu1 %v1886_v13 }
  0x36   : > { %1790 = vmatmul.mubr.msk.f32.gmra.mrb[2].mxu0 %vm681_vm0, %v660_v58 }
  0x37   : > { %1792 = vmatprep.mubr.msk.f32.mxu0 %vm681_vm0, %v661_v60 }
  0x3a   : > { %1793 = vmatmul.mubr.msk.f32.gmra.mrb[4].mxu0 %vm681_vm0, %v662_v1 }
  0x3b   : > { %1795 = vmatprep.mubr.msk.f32.mxu0 %vm681_vm0, %v663_v2 }
  0x3e   : > { %1796 = vmatmul.mubr.msk.f32.gmra.mrb[6].mxu0 %vm681_vm0, %v664_v4 }
  0xf8   : > { %v1732_v14 = vpop.f32.mrb[0].mxu1 }
  0xf9   : > { %v772_v15 = vpop.f32.mrb[1].mxu1 }
  0xfc   : > { %v1735_v16 = vpop.f32.mrb[2].mxu1 }
  0xfd   : > { %v782_v17 = vpop.f32.mrb[3].mxu1 }
 0x100   : > { %v1738_v19 = vpop.f32.mrb[4].mxu1 }
 0x101   : > { %v792_v20 = vpop.f32.mrb[5].mxu1 }
 0x104   : > { %v1741_v24 = vpop.f32.mrb[6].mxu1 }
 0x105   : > { %v1788_v21 = vpop.f32.mrb[0].mxu0  ;;  %v802_v28 = vpop.f32.mrb[7].mxu1 }
 0x106   : > { %v1890_v25 = vadd.f32 %v1788_v21, %v1732_v14  ;;  %v1030_v27 = vpop.f32.mrb[1].mxu0 }
 0x107   : > { %v1891_v29 = vadd.f32 %v1030_v27, %v772_v15 }
 0x108   : > { %v1085_v30 = vadd.f32 %v1890_v25, %v1613_v22 }
 0x109   : > { %v1084_v31 = vadd.f32 %v1891_v29, %v1613_v22  ;;  %v1791_v33 = vpop.f32.mrb[2].mxu0 }
 0x10a   : > { %v1892_v34 = vadd.f32 %v1791_v33, %v1735_v16  ;;  %v1040_v18 = vpop.f32.mrb[3].mxu0  ;;  %v1093_v37 = vmax.f32 %v1085_v30, 0.0 }
 0x10b   : > { %v1092_v35 = vmax.f32 %v1084_v31, 0.0  ;;  %v1893_v36 = vadd.f32 %v1040_v18, %v782_v17 }
 0x10c   : > { %v1087_v38 = vadd.f32 %v1892_v34, %v1613_v22 }
 0x10d   : > { %v1086_v26 = vadd.f32 %v1893_v36, %v1613_v22  ;;  %v1794_v39 = vpop.f32.mrb[4].mxu0  ;;  %1814 = vmatprep.mubr.msk.f32.mxu1 %vm681_vm0, %v1092_v35 }
 0x10e   : > { %v1894_v40 = vadd.f32 %v1794_v39, %v1738_v19  ;;  %v1050_v41 = vpop.f32.mrb[5].mxu0  ;;  %1815 = vmatmul.mubr.msk.f32.vlgmr.msra.gmra.mrb[8].mxu1 %vm681_vm0, %v1093_v37  ;;  %v1095_v44 = vmax.f32 %v1087_v38, 0.0 }
 0x10f   : > { %v1094_v42 = vmax.f32 %v1086_v26, 0.0  ;;  %v1895_v43 = vadd.f32 %v1050_v41, %v792_v20 }
 0x110   : > { %v1089_v46 = vadd.f32 %v1894_v40, %v1613_v22 }
 0x111   : > { %v1088_v47 = vadd.f32 %v1895_v43, %v1613_v22  ;;  %v1797_v48 = vpop.f32.mrb[6].mxu0  ;;  %1817 = vmatprep.mubr.msk.f32.mxu1 %vm681_vm0, %v1094_v42 }
 0x112   : > { %v1896_v49 = vadd.f32 %v1797_v48, %v1741_v24  ;;  %v1060_v50 = vpop.f32.mrb[7].mxu0  ;;  %1818 = vmatmul.mubr.msk.f32.gmra.mrb[10].mxu1 %vm681_vm0, %v1095_v44  ;;  %v1097_v55 = vmax.f32 %v1089_v46, 0.0 }
 0x113   : > { %v1096_v51 = vmax.f32 %v1088_v47, 0.0  ;;  %v1897_v53 = vadd.f32 %v1060_v50, %v802_v28 }
 0x114   : > { %v1091_v56 = vadd.f32 %v1896_v49, %v1613_v22 }
 0x115   : > { %v1090_v54 = vadd.f32 %v1897_v53, %v1613_v22  ;;  %1820 = vmatprep.mubr.msk.f32.mxu1 %vm681_vm0, %v1096_v51 }
 0x116   : > { %1821 = vmatmul.mubr.msk.f32.gmra.mrb[12].mxu1 %vm681_vm0, %v1097_v55  ;;  %v1099_v58 = vmax.f32 %v1091_v56, 0.0 }
 0x117   : > { %v1098_v57 = vmax.f32 %v1090_v54, 0.0 }
 0x119   : > { %1823 = vmatprep.mubr.msk.f32.mxu1 %vm681_vm0, %v1098_v57 }
 0x11a   : > { %1824 = vmatmul.mubr.msk.f32.gmra.mrb[14].mxu1 %vm681_vm0, %v1099_v58 }
 0x1e1   : > { %v1816_v60 = vpop.f32.mrb[8].mxu1 }
 0x1e2   : > { %v1211_v61 = vadd.f32 %v1816_v60, %v1614_v59  ;;  %v1205_v63 = vpop.f32.mrb[9].mxu1 }
 0x1e3   : > { %v1206_v0 = vadd.f32 %v1614_v59, %v1205_v63 }
 0x1e4   : > { %v1245_v1 = vadd.f32 %v1211_v61, %v2351_v32 }
 0x1e5   : > { %v1244_v2 = vadd.f32 %v1206_v0, %v2323_v23  ;;  %v1819_v3 = vpop.f32.mrb[10].mxu1 }
 0x1e6   : > { %1253 = vst.msk [vmem:[%s2583_s16 + $0x8] sm:$0xff] %vm681_vm0, %v1245_v1  ;;  %v1221_v4 = vadd.f32 %v1819_v3, %v1614_v59  ;;  %v1215_v5 = vpop.f32.mrb[11].mxu1 }
 0x1e7   : > { %1252 = vst.msk [vmem:[%s2583_s16] sm:$0xff] %vm681_vm0, %v1244_v2  ;;  %v1216_v7 = vadd.f32 %v1614_v59, %v1215_v5 }
 0x1e8   : > { %v1247_v32 = vadd.f32 %v1221_v4, %v2400_v52 }
 0x1e9   : > { %v1246_v23 = vadd.f32 %v1216_v7, %v2385_v45  ;;  %v1822_v8 = vpop.f32.mrb[12].mxu1 }
 0x1ea   : > { %1255 = vst.msk [vmem:[%s2583_s16 + $0x18] sm:$0xff] %vm681_vm0, %v1247_v32  ;;  %v1231_v9 = vadd.f32 %v1822_v8, %v1614_v59  ;;  %v1225_v12 = vpop.f32.mrb[13].mxu1 }
 0x1eb   : > { %1254 = vst.msk [vmem:[%s2583_s16 + $0x10] sm:$0xff] %vm681_vm0, %v1246_v23  ;;  %v1226_v13 = vadd.f32 %v1614_v59, %v1225_v12 }
 0x1ec   : > { %v1249_v14 = vadd.f32 %v1231_v9, %v2441_v6 }
 0x1ed   : > { %v1248_v15 = vadd.f32 %v1226_v13, %v2424_v62  ;;  %v1825_v16 = vpop.f32.mrb[14].mxu1  ;;  %1266 = sbr.rel (!%p2244_p5) target bundleno = 549 (0x225), region = 60 }
 0x1ee   : > { %1257 = vst.msk [vmem:[%s2583_s16 + $0x28] sm:$0xff] %vm681_vm0, %v1249_v14  ;;  %v1241_v52 = vadd.f32 %v1825_v16, %v1614_v59  ;;  %v1235_v17 = vpop.f32.mrb[15].mxu1 }
 0x1ef   : > { %1256 = vst.msk [vmem:[%s2583_s16 + $0x20] sm:$0xff] %vm681_vm0, %v1248_v15  ;;  %v1236_v45 = vadd.f32 %v1614_v59, %v1235_v17 }
 0x1f0   : > { %v1251_v19 = vadd.f32 %v1241_v52, %v2451_v11 }
 0x1f1   : > { %v1250_v20 = vadd.f32 %v1236_v45, %v2448_v10 }
 0x1f2   : > { %1259 = vst.msk [vmem:[%s2583_s16 + $0x38] sm:$0xff] %vm681_vm0, %v1251_v19 }
 0x1f3   : > { %1258 = vst.msk [vmem:[%s2583_s16 + $0x30] sm:$0xff] %vm681_vm0, %v1250_v20 }
 0x1f4   : > { %s2722_s30 = smov (!%p1269_p0, %s1268_s30), 8 }
 0x1f5   : > { %s1625_s21 = sshll.u32 %s2722_s30, 7 }
 0x1f6   : > { %p1628_p1 = scmp.eq.s32.totalorder %s1625_s21, 0 }
 0x1f7   : > { %s2621_s20 = sshrl.u32 (!%p1628_p1), %s2722_s30, 3 }
 0x1f8   : > { %1279 = sbr.rel (%p1628_p1) target bundleno = 549 (0x225), region = 64  ;;  %p1629_p2 = scmp.le.s32.totalorder (!%p1628_p1), %s2621_s20, 0 }
 0x1ff   : > { %1494 = sbr.rel (%p1629_p2) target bundleno = 528 (0x210), region = 146  ;;  %s2700_s12 = smov (!%p1629_p2), %s2618_s17 }
 0x200   : > { %s2701_s19 = smov (!%p1629_p2), %s2583_s16  ;;  %s2630_s22 = smov (!%p1629_p2), 0  }
 0x201   : > { %s2632_s26 = smov (!%p1629_p2), 0  }
 0x206 LB: >> { %v1355_v62 = vld [vmem:[%s2122_s19] sm:$0xff]  ;;  %v1357_v6 = vld [vmem:[%s2122_s19 + $0x8] sm:$0xff]  ;;  %v1359_v10 = vld [vmem:[%s2122_s19 + $0x10] sm:$0xff]  ;;  %s1371_s25 = sadd.s32 1, %s2126_s22  ;;  %s1349_s26 = sadd.s32 1, %s2130_s26   ;;  %s2130_s26 = sphi %s2632_s26, %s1349_s26   ;;  %s2126_s22 = sphi %s2630_s22, %s2702_s22   ;;  %s2122_s19 = sphi %s2701_s19, %s1376_s19   ;;  %s2118_s12 = sphi %s2700_s12, %s1377_s12  }
 0x207   : >> { %1356 = vst [vmem:[%s2118_s12] sm:$0xff] %v1355_v62  ;;  %1358 = vst [vmem:[%s2118_s12 + $0x8] sm:$0xff] %v1357_v6  ;;  %v1361_v11 = vld [vmem:[%s2122_s19 + $0x18] sm:$0xff]  ;;  %v1363_v21 = vld [vmem:[%s2122_s19 + $0x20] sm:$0xff]  ;;  %p1372_p3 = scmp.ge.s32.totalorder %s1371_s25, %s2621_s20  ;;  %p1348_p4 = scmp.ge.s32.totalorder %s1349_s26, %s2621_s20 }
 0x208   : >> { %1360 = vst [vmem:[%s2118_s12 + $0x10] sm:$0xff] %v1359_v10  ;;  %v1365_v22 = vld [vmem:[%s2122_s19 + $0x28] sm:$0xff]  ;;  %1362 = vst [vmem:[%s2118_s12 + $0x18] sm:$0xff] %v1361_v11  ;;  %v1367_v24 = vld [vmem:[%s2122_s19 + $0x30] sm:$0xff] }
 0x209   : >> { %1364 = vst [vmem:[%s2118_s12 + $0x20] sm:$0xff] %v1363_v21  ;;  %1366 = vst [vmem:[%s2118_s12 + $0x28] sm:$0xff] %v1365_v22  ;;  %v1369_v25 = vld [vmem:[%s2122_s19 + $0x38] sm:$0xff]  ;;  %s2724_s25 = smov (%p1372_p3, %s1371_s25), 0  ;;  %1351 = sbr.rel (!%p1348_p4) target bundleno = 518 (0x206), region = 152 }
 0x20a   : >> { %1368 = vst [vmem:[%s2118_s12 + $0x30] sm:$0xff] %v1367_v24  ;;  %1370 = vst [vmem:[%s2118_s12 + $0x38] sm:$0xff] %v1369_v25  ;;  %s1630_s29 = sshll.u32 %s2724_s25, 6  ;;  %s2702_s22 = smov %s2724_s25 }
 0x20b   : >> { %s1376_s19 = scalar_lea.vmem %s2583_s16, %s1630_s29 [#allocation2]   ;;  %s1377_s12 = scalar_lea.vmem %s2618_s17, %s1630_s29  }
 0x210 PF: > { %s2651_s27 = sand.u32 7, %s2722_s30   ;;  %s1648_s28 = sshll.u32 %s2621_s20, 6 }
 0x211   : > { %s1382_s18 = scalar_lea.vmem %s2583_s16, %s1648_s28 [#allocation2]   ;;  %s1384_s14 = scalar_lea.vmem %s2618_s17, %s1648_s28  }
 0x212   : > { %p1635_p5 = scmp.le.s32.totalorder %s2651_s27, 0 }
 0x213   : > { %s2132_s11 = smov (!%p1635_p5), %s1384_s14   ;;  %s2136_s21 = smov (!%p1635_p5), %s1382_s18  }
 0x214   : > { %1508 = sbr.rel (%p1635_p5) target bundleno = 549 (0x225), region = 157  ;;  %s2140_s13 = smov (!%p1635_p5), 0  }
 0x215   : > { %s2144_s23 = smov (!%p1635_p5), 0  }
 0x21b LB: >> { %v1394_v27 = vld [vmem:[%s2138_s21] sm:$0xff]  ;;  %s1396_s30 = sadd.s32 1, %s2142_s13  ;;  %s1388_s23 = sadd.s32 1, %s2146_s23   ;;  %s2146_s23 = sphi %s2144_s23, %s1388_s23   ;;  %s2142_s13 = sphi %s2140_s13, %s2141_s13   ;;  %s2138_s21 = sphi %s2136_s21, %s1401_s21   ;;  %s2134_s11 = sphi %s2132_s11, %s1402_s11  }
 0x21c   : >> { %1395 = vst [vmem:[%s2134_s11] sm:$0xff] %v1394_v27  ;;  %p1397_p6 = scmp.ge.s32.totalorder %s1396_s30, %s2651_s27  ;;  %p1387_p7 = scmp.ge.s32.totalorder %s1388_s23, %s2651_s27 }
 0x21e   : >> { %s2726_s30 = smov (%p1397_p6, %s1396_s30), 0  ;;  %1390 = sbr.rel (!%p1387_p7) target bundleno = 539 (0x21b), region = 163 }
 0x21f   : >> { %s1636_s16 = sshll.u32 %s2726_s30, 3  ;;  %s2141_s13 = smov %s2726_s30  }
 0x220   : >> { %s1401_s21 = scalar_lea.vmem %s1382_s18, %s1636_s16 [#allocation2]   ;;  %s1402_s11 = scalar_lea.vmem %s1384_s14, %s1636_s16  }
 0x225 PF: > { %s19_s15 = sadd.s32 1, %s2114_s15   ;;  %s2703_s11 = sld [smem:[#allocation3_spill]] }
 0x226   : > { %p16_p8 = scmp.ge.s32.totalorder %s19_s15, 8   ;;  %s2704_s12 = sld [smem:[#allocation4_spill]] }
 0x227   : > { %s2705_s13 = sld [smem:[#allocation5_spill]]  ;;  %s2706_s14 = sld [smem:[#allocation6_spill]] }
 0x228   : > { %s2707_s30 = smov %s2094_s10  ;;  %s2708_s10 = smov %s2255_s24 }
 0x229   :  { %18 = sbr.rel (!%p16_p8) target bundleno = 4 (0x4), region = 174 }

</bundles_post_ra>
